<compile_context>
chip_gen: v7x
topology: tpu7x:2x2x1
jax: 0.10.0
libtpu: 0.0.40
codegen_flags: <defaults>
</compile_context>

<pallas_src>
import jax
import jax.numpy as jnp
from jax.experimental import pallas as pl
from jax.experimental.pallas import tpu as pltpu


def _global_predictor_kernel(x_ref, w1_ref, b1_ref, w2_ref, b2_ref, out_ref):
    """One batch tile of the GlobalPredictor head (eval mode).

    x_ref  : (TM, d_model)    f32   streamed over the batch axis
    w1_ref : (d_model, d_h)   bf16  fc1 weight with eval-BN folded in (VMEM-resident)
    b1_ref : (1, d_h)         f32   fc1 bias with eval-BN folded in
    w2_ref : (d_out_pad, d_h) bf16  fc2 weight, PyTorch layout, rows zero-padded to 8
    b2_ref : (d_out_pad, 1)   f32   fc2 bias (column vector), rows zero-padded
    out_ref: (d_out, TM)      f32   transposed compact output
    """
    # In-kernel bf16 cast of the streamed tile (VPU; hides under DMA slack).
    x = x_ref[...].astype(w1_ref.dtype)

    # fc1 (+ folded BatchNorm) -> tanh; accumulate / bias / tanh stay in f32.
    h = jnp.tanh(
        jnp.dot(x, w1_ref[...], preferred_element_type=jnp.float32) + b1_ref[...]
    )
    # dropout is identity in eval mode.

    # fc2, computed directly in transposed form: out_t = w2 @ h^T + b2 (NT matmul).
    out_t = (
        jax.lax.dot_general(
            w2_ref[...],
            h.astype(w2_ref.dtype),
            dimension_numbers=(((1,), (1,)), ((), ())),
            preferred_element_type=jnp.float32,
        )
        + b2_ref[...]
    )

    d_out = out_ref.shape[0]
    out_ref[...] = out_t[:d_out].astype(out_ref.dtype)


def _pick_tm(n, cap=8192):
    """Batch tile: single full block for small N, else ~N/4 (multiple of 128), capped."""
    if n <= 4096:
        return n
    tm = max(1024, min(cap, (n // 4 // 128) * 128))
    return tm


# Tri-state cache for CORE_PARALLEL support on the current chip/toolchain.
_CORE_PARALLEL_OK = None


def global_predictor_forward(x, params, *, eps=1e-5, tm=None, use_bf16=True,
                             return_transposed=False):
    """Eval-mode GlobalPredictor forward (BatchNorm1d -> fc1 -> tanh -> [dropout] -> fc2).

    x      : (N, d_model) float32.
    params : PyTorch-layout weights:
             bn_gamma/bn_beta/bn_mean/bn_var (d_model,), w1 (d_h, d_model), b1 (d_h,),
             w2 (d_out, d_h), b2 (d_out,).
    Returns (N, d_out) f32 (matching the PyTorch module), or the kernel's native
    compact transposed (d_out, N) array if return_transposed=True — preferred for
    consumers that can take it, since it avoids even the tiny wrapper transpose.
    """
    global _CORE_PARALLEL_OK

    n, d_model = x.shape
    d_h = params["w1"].shape[0]
    d_out = params["w2"].shape[0]

    f32 = jnp.float32
    w1t = params["w1"].T.astype(f32)            # (d_model, d_h)
    b1 = params["b1"].astype(f32)               # (d_h,)
    w2 = params["w2"].astype(f32)               # (d_out, d_h) -- kept in PyTorch layout
    b2 = params["b2"].astype(f32)               # (d_out,)

    # The PyTorch module only applies BatchNorm when batch size != 1 (a static-shape
    # condition, resolved at trace time) -- reproduce that guard exactly.
    if n != 1:
        # Fold eval-mode BN into fc1 (once, in f32, outside the kernel):
        #   bn(x) = x * s + (beta - mean * s),  s = gamma * rsqrt(var + eps)
        #   bn(x) @ w1t + b1 = x @ (s[:, None] * w1t) + (b1 + (beta - mean*s) @ w1t)
        s = params["bn_gamma"].astype(f32) * jax.lax.rsqrt(
            params["bn_var"].astype(f32) + eps)
        shift = params["bn_beta"].astype(f32) - params["bn_mean"].astype(f32) * s
        b1 = b1 + shift @ w1t
        w1t = s[:, None] * w1t

    # Pad fc2 rows to a sublane multiple (8) for MXU/layout friendliness.  Padded rows
    # are zeros and are never written to HBM (output stays compact (d_out, N)).
    d_out_pad = ((d_out + 7) // 8) * 8
    if d_out_pad != d_out:
        w2 = jnp.pad(w2, ((0, d_out_pad - d_out), (0, 0)))
        b2 = jnp.pad(b2, (0, d_out_pad - d_out))

    mxu_dtype = jnp.bfloat16 if use_bf16 else f32
    w1_in = w1t.astype(mxu_dtype)               # (d_model, d_h)    VMEM-resident
    w2_in = w2.astype(mxu_dtype)                # (d_out_pad, d_h)  VMEM-resident
    b1_in = b1.reshape(1, d_h)                  # (1, d_h)          f32
    b2_in = b2.reshape(d_out_pad, 1)            # (d_out_pad, 1)    f32
    # x stays in its f32 HBM layout; the bf16 cast happens inside the kernel.

    # Batch tile (when tiled, it is the lane dim of the output -> multiple of 128).
    tm = _pick_tm(n) if tm is None else int(min(tm, n))
    if tm != n and tm % 128 != 0:
        tm = max(128, (tm // 128) * 128)
    num_steps = pl.cdiv(n, tm)

    cost = pl.CostEstimate(
        flops=2 * n * d_h * (d_model + d_out_pad),
        transcendentals=n * d_h,
        bytes_accessed=(n * d_model * 4 + n * d_out * 4
                        + (d_model + d_out_pad) * d_h * 2 + (d_h + d_out_pad) * 4),
    )

    def run(dim_semantics):
        return pl.pallas_call(
            _global_predictor_kernel,
            out_shape=jax.ShapeDtypeStruct((d_out, n), f32),
            grid=(num_steps,),
            in_specs=[
                pl.BlockSpec((tm, d_model), lambda i: (i, 0)),      # x: streamed over N
                pl.BlockSpec((d_model, d_h), lambda i: (0, 0)),     # w1: resident
                pl.BlockSpec((1, d_h), lambda i: (0, 0)),           # b1
                pl.BlockSpec((d_out_pad, d_h), lambda i: (0, 0)),   # w2
                pl.BlockSpec((d_out_pad, 1), lambda i: (0, 0)),     # b2
            ],
            out_specs=pl.BlockSpec((d_out, tm), lambda i: (0, i)),  # compact, lane-dense
            compiler_params=pltpu.CompilerParams(
                dimension_semantics=dim_semantics,
                vmem_limit_bytes=32 * 1024 * 1024,  # raise v5e's 16 MiB scoped default
            ),
            cost_estimate=cost,
        )(x, w1_in, b1_in, w2_in, b2_in)

    # CORE_PARALLEL splits the batch grid across both TensorCores on v7x; fall back to
    # ARBITRARY if this chip/toolchain rejects it (single-TC chips behave the same).
    out_t = None
    if num_steps >= 2 and _CORE_PARALLEL_OK is not False:
        try:
            out_t = run((pltpu.CORE_PARALLEL,))
            _CORE_PARALLEL_OK = True
        except Exception:  # any lowering/compile rejection -> safe fallback
            _CORE_PARALLEL_OK = False
            out_t = None
    if out_t is None:
        out_t = run((pltpu.ARBITRARY,))

    if return_transposed:
        return out_t                 # (d_out, N): no extra HBM pass at all
    return out_t.T                   # tiny (12 B/row) transpose back to PyTorch layout


def make_params(key, d_model, d_h, d_out):
    ks = jax.random.split(key, 8)
    return {
        "bn_gamma": jax.random.uniform(ks[0], (d_model,), jnp.float32, 0.5, 1.5),
        "bn_beta": jax.random.normal(ks[1], (d_model,), jnp.float32) * 0.1,
        "bn_mean": jax.random.normal(ks[2], (d_model,), jnp.float32) * 0.1,
        "bn_var": jax.random.uniform(ks[3], (d_model,), jnp.float32, 0.5, 1.5),
        "w1": jax.random.normal(ks[4], (d_h, d_model), jnp.float32) * 0.1,
        "b1": jax.random.normal(ks[5], (d_h,), jnp.float32) * 0.1,
        "w2": jax.random.normal(ks[6], (d_out, d_h), jnp.float32) * 0.1,
        "b2": jax.random.normal(ks[7], (d_out,), jnp.float32) * 0.1,
    }


def _reference_f32(x, p, eps=1e-5):
    """Pure-f32 reference matching the PyTorch eval-mode forward."""
    if x.shape[0] != 1:
        x = (x - p["bn_mean"]) / jnp.sqrt(p["bn_var"] + eps) * p["bn_gamma"] + p["bn_beta"]
    h = jnp.tanh(x @ p["w1"].T + p["b1"])
    return h @ p["w2"].T + p["b2"]


def _reference_mixed(x, p, eps=1e-5):
    """Reference mirroring the kernel's bf16-MXU / f32-accumulate arithmetic."""
    f32, bf = jnp.float32, jnp.bfloat16
    w1t = p["w1"].T.astype(f32)
    b1 = p["b1"].astype(f32)
    w2 = p["w2"].astype(f32)
    b2 = p["b2"].astype(f32)
    if x.shape[0] != 1:
        s = p["bn_gamma"].astype(f32) * jax.lax.rsqrt(p["bn_var"].astype(f32) + eps)
        b1 = b1 + (p["bn_beta"].astype(f32) - p["bn_mean"].astype(f32) * s) @ w1t
        w1t = s[:, None] * w1t
    h = jnp.tanh(jnp.dot(x.astype(bf), w1t.astype(bf),
                         preferred_element_type=f32) + b1)
    return jnp.dot(h.astype(bf), w2.T.astype(bf), preferred_element_type=f32) + b2


if __name__ == "__main__":
    key = jax.random.PRNGKey(0)
    k_x, k_p, k_x2 = jax.random.split(key, 3)

    # Readout-head shapes of VEPModel: d_model = ns*2 (small), d_h = 128, d_out = 3.
    N, D_MODEL, D_H, D_OUT = 8, 32, 128, 3
    params = make_params(k_p, D_MODEL, D_H, D_OUT)

    # Small-shape single-step path (matches the module's (N, d_out) output layout).
    x = jax.random.normal(k_x, (N, D_MODEL), jnp.float32)
    out = jax.block_until_ready(global_predictor_forward(x, params))
    assert out.shape == (N, D_OUT)
    assert jnp.allclose(out, _reference_mixed(x, params), atol=1e-2, rtol=1e-2), \
        "mismatch vs mixed-precision (bf16-MXU) reference"
    assert jnp.allclose(out, _reference_f32(x, params), atol=1e-1, rtol=1e-1), \
        "mismatch vs f32 reference"

    # Multi-step grid (+ CORE_PARALLEL on v7x) with a ragged last block, consuming the
    # kernel's native compact transposed output.
    N2 = 12416   # -> TM = 3072, 5 grid steps, partial final block of 128 rows
    x2 = jax.random.normal(k_x2, (N2, D_MODEL), jnp.float32)
    out2_t = jax.block_until_ready(
        global_predictor_forward(x2, params, return_transposed=True))
    assert out2_t.shape == (D_OUT, N2)
    assert jnp.allclose(out2_t.T, _reference_mixed(x2, params), atol=1e-2, rtol=1e-2), \
        "tiled path mismatch vs mixed-precision reference"
    assert jnp.allclose(out2_t.T, _reference_f32(x2, params), atol=1e-1, rtol=1e-1), \
        "tiled path mismatch vs f32 reference"

    print("KERNEL_OK")
</pallas_src>

<mosaic_0001>
module attributes {stable_mosaic.version = 11 : i64} {
  func.func @_global_predictor_kernel(%arg0: i32, %arg1: memref<8x32xf32, #tpu.memory_space<vmem>>, %arg2: memref<32x128xbf16, #tpu.memory_space<vmem>>, %arg3: memref<1x128xf32, #tpu.memory_space<vmem>>, %arg4: memref<8x128xbf16, #tpu.memory_space<vmem>>, %arg5: memref<8x1xf32, #tpu.memory_space<vmem>>, %arg6: memref<3x8xf32, #tpu.memory_space<vmem>>) attributes {dimension_semantics = [#tpu.dimension_semantics<arbitrary>], iteration_bounds = array<i64: 1>, scalar_prefetch = 0 : i64, scratch_operands = 0 : i64, tpu.core_type = #tpu.core_type<tc>, window_params = [{transform_indices = @transform_0, window_bounds = array<i64: 8, 32>}, {pipeline_mode = #tpu.pipeline_mode<synchronous>, transform_indices = @transform_1, window_bounds = array<i64: 32, 128>}, {pipeline_mode = #tpu.pipeline_mode<synchronous>, transform_indices = @transform_2, window_bounds = array<i64: 1, 128>}, {pipeline_mode = #tpu.pipeline_mode<synchronous>, transform_indices = @transform_3, window_bounds = array<i64: 8, 128>}, {pipeline_mode = #tpu.pipeline_mode<synchronous>, transform_indices = @transform_4, window_bounds = array<i64: 8, 1>}, {transform_indices = @transform_5, window_bounds = array<i64: 3, 8>}]} {
    %c0 = arith.constant 0 : index
    %c0_0 = arith.constant 0 : index
    %0 = vector.load %arg1[%c0, %c0_0] : memref<8x32xf32, #tpu.memory_space<vmem>>, vector<8x32xf32>
    %1 = arith.truncf %0 : vector<8x32xf32> to vector<8x32xbf16>
    %c0_1 = arith.constant 0 : index
    %c0_2 = arith.constant 0 : index
    %2 = vector.load %arg2[%c0_1, %c0_2] : memref<32x128xbf16, #tpu.memory_space<vmem>>, vector<32x128xbf16>
    %cst = arith.constant dense<0.000000e+00> : vector<8x128xf32>
    %3 = tpu.matmul %1, %2, %cst {dimension_numbers = #tpu.dot_dimension_numbers<[1], [0], [0], [1], [0, 0, 1, 1], [], []>} : vector<8x32xbf16>, vector<32x128xbf16>, vector<8x128xf32> -> vector<8x128xf32>
    %c0_3 = arith.constant 0 : index
    %c0_4 = arith.constant 0 : index
    %4 = vector.load %arg3[%c0_3, %c0_4] : memref<1x128xf32, #tpu.memory_space<vmem>>, vector<1x128xf32>
    %5 = vector.broadcast %4 : vector<1x128xf32> to vector<8x128xf32>
    %6 = arith.addf %3, %5 : vector<8x128xf32>
    %7 = math.tanh %6 : vector<8x128xf32>
    %c0_5 = arith.constant 0 : index
    %c0_6 = arith.constant 0 : index
    %8 = vector.load %arg4[%c0_5, %c0_6] : memref<8x128xbf16, #tpu.memory_space<vmem>>, vector<8x128xbf16>
    %9 = arith.truncf %7 : vector<8x128xf32> to vector<8x128xbf16>
    %cst_7 = arith.constant dense<0.000000e+00> : vector<8x8xf32>
    %10 = tpu.matmul %8, %9, %cst_7 {dimension_numbers = #tpu.dot_dimension_numbers<[1], [1], [0], [0], [0, 0, 1, 0], [], []>} : vector<8x128xbf16>, vector<8x128xbf16>, vector<8x8xf32> -> vector<8x8xf32>
    %c0_8 = arith.constant 0 : index
    %c0_9 = arith.constant 0 : index
    %11 = vector.load %arg5[%c0_8, %c0_9] : memref<8x1xf32, #tpu.memory_space<vmem>>, vector<8x1xf32>
    %12 = vector.broadcast %11 : vector<8x1xf32> to vector<8x8xf32>
    %13 = arith.addf %10, %12 : vector<8x8xf32>
    %14 = vector.extract_strided_slice %13 {offsets = [0, 0], sizes = [3, 8], strides = [1, 1]} : vector<8x8xf32> to vector<3x8xf32>
    %c0_10 = arith.constant 0 : index
    %c0_11 = arith.constant 0 : index
    %15 = vector.load %arg6[%c0_10, %c0_11] : memref<3x8xf32, #tpu.memory_space<vmem>>, vector<3x8xf32>
    tpu.vector_store %arg6[%c0_10, %c0_11], %14 {strides = array<i32>} : memref<3x8xf32, #tpu.memory_space<vmem>>, vector<3x8xf32>,
    return
  }
  func.func @transform_0(%arg0: i32) -> (i32, i32) {
    %c0_i32 = arith.constant 0 : i32
    %c0_i32_0 = arith.constant 0 : i32
    return %arg0, %c0_i32 : i32, i32
  }
  func.func @transform_1(%arg0: i32) -> (i32, i32) {
    %c0_i32 = arith.constant 0 : i32
    %c0_i32_0 = arith.constant 0 : i32
    %c0_i32_1 = arith.constant 0 : i32
    return %c0_i32, %c0_i32_0 : i32, i32
  }
  func.func @transform_2(%arg0: i32) -> (i32, i32) {
    %c0_i32 = arith.constant 0 : i32
    %c0_i32_0 = arith.constant 0 : i32
    %c0_i32_1 = arith.constant 0 : i32
    return %c0_i32, %c0_i32_0 : i32, i32
  }
  func.func @transform_3(%arg0: i32) -> (i32, i32) {
    %c0_i32 = arith.constant 0 : i32
    %c0_i32_0 = arith.constant 0 : i32
    %c0_i32_1 = arith.constant 0 : i32
    return %c0_i32, %c0_i32_0 : i32, i32
  }
  func.func @transform_4(%arg0: i32) -> (i32, i32) {
    %c0_i32 = arith.constant 0 : i32
    %c0_i32_0 = arith.constant 0 : i32
    %c0_i32_1 = arith.constant 0 : i32
    return %c0_i32, %c0_i32_0 : i32, i32
  }
  func.func @transform_5(%arg0: i32) -> (i32, i32) {
    %c0_i32 = arith.constant 0 : i32
    %c0_i32_0 = arith.constant 0 : i32
    return %c0_i32, %arg0 : i32, i32
  }
}

</mosaic_0001>

<bundles_post_ra>
// kernel: tpu_custom_call.1
= control target key start
LH: loop header
LB: loop body
LE: loop exit
PB: predicated region body
PF: predicated region fallthrough
CT: control target
= control target key end

     0   :  { %10 = vsyncpa [#allocation3], 0  ;;  %s327_s0 = inlined_call_operand.vmem [shape: f32[8,32], index: 0, kind: input, shape index: {}]   ;;  %s328_s1 = inlined_call_operand.hbm [shape: bf16[32,128], index: 1, kind: input, shape index: {}]   ;;  %s329_s2 = inlined_call_operand.vmem [shape: f32[1,128], index: 2, kind: input, shape index: {}]   ;;  %s330_s3 = inlined_call_operand.vmem [shape: bf16[8,128], index: 3, kind: input, shape index: {}]   ;;  %s331_s4 = inlined_call_operand.vmem [shape: f32[8,1], index: 4, kind: input, shape index: {}]   ;;  %s332_s5 = inlined_call_operand.hbm [shape: f32[3,8], index: 5, kind: output, shape index: {}]  }
   0x1   :  { %11 = vsyncpa [#allocation4], 0  ;;  %s254_s18 = smov [#allocation2]   ;;  %s206_s22 = scalar_lea.hbm %s328_s1, 256 }
   0x2   :  { %s19_s19 = sshll.u32 %s254_s18, 4  ;;  %p207_p0 = scmp.ne.s32.totalorder %s328_s1, %s206_s22  ;;  %s20_s19 = int_to_ptr.vmem [resolvable:$true] %s19_s19 }
   0x3   :  { %p210_p1 = scmp.lt.u32.totalorder %s206_s22, %s328_s1 }
   0x5   :  { %p212_p2 = pnand %p210_p1, %p207_p0 }
   0x7   :  { %215 = shalt.err (!%p212_p2)
}
   0x8   :  { %s216_s27 = scalar_lea.vmem %s20_s19, 256  ;;  %p221_p4 = scmp.lt.s32.totalorder %s20_s19, %s20_s19 }
   0x9   :  { %p217_p3 = scmp.ne.s32.totalorder %s20_s19, %s216_s27  ;;  %p222_p5 = scmp.lt.s32.totalorder %s216_s27, %s216_s27 }
   0xb   :  { %p223_p6 = por %p222_p5, %p221_p4 }
   0xd   :  { %p224_p7 = pnand %p223_p6, %p217_p3 }
   0xf   :  { %227 = shalt.err (!%p224_p7)
}
  0x10   :  { %s255_s28 = smov 64   ;;  %s256_s29 = smov 4  }
  0x11   :  { %25 = dma.hbm_to_vmem [thread:$0]  %s328_s1, 256, %s20_s19, [#allocation3], %s255_s28, %s255_s28, %s256_s29  }
  0x12   :  { %250 = dma.done.wait [#allocation3], 256  }
  0x13   :  { %251 = vsyncadd [#allocation3], 4294967040  ;;  %v257_v0 = vmov 0.0   ;;  %vm258_vm0 = vmmov 0   ;;  %v202_v1 = vld [vmem:[#allocation2] sm:$0xff]   ;;  %v203_v2 = vld [vmem:[#allocation2 + $0x8] sm:$0xff]  }
  0x14   :  { %180 = vmatprep.subr.bf16.mxu0 %v257_v0  ;;  %184 = vmatprep.mubr.msk.bf16.mxu0 %vm258_vm0, %v257_v0  ;;  %v36_v3 = vld [vmem:[%s327_s0] sm:$0xff]  ;;  %vm61_vm1 = vcmask 261120   ;;  %v259_v6 = vmov 0   ;;  %vm154_vm2 = vcmask 59392  }
  0x15   :  { %188 = vmatprep.subr.bf16.mxu1 %v257_v0  ;;  %190 = vmatprep.mubr.msk.bf16.mxu1 %vm258_vm0, %v257_v0  ;;  %v37_v4 = vpack.c.bf16 %v36_v3, %v36_v3  ;;  %v108_v5 = vld [vmem:[%s331_s4] sm:$0xff]  ;;  %s260_s4 = smov [#allocation5]  }
  0x16   :  { %181 = vmatpush3.bf16.msra.mxu0 %v202_v1  ;;  %201 = vset.pattern.permute.xlu0 %v259_v6  ;;  %v171_v7 = vld [vmem:[%s329_s2] ss:$0 sm:$0xff]  ;;  %s162_s13 = sshll.u32 %s260_s4, 4  ;;  %s163_s13 = int_to_ptr.vmem [resolvable:$true] %s162_s13 }
  0x17   :  { %182 = vmatprep.subr.bf16.mxu0 %v257_v0  ;;  %111 = vperm.xlu0 %201, %v108_v5   ;;  %v106_v15 = vld [vmem:[%s330_s3] sm:$0xf]  ;;  %s228_s2 = scalar_lea.vmem %s163_s13, 64  ;;  %p233_p9 = scmp.lt.s32.totalorder %s163_s13, %s163_s13 }
  0x18   :  { %p229_p8 = scmp.ne.s32.totalorder %s163_s13, %s228_s2  ;;  %p234_p10 = scmp.lt.s32.totalorder %s228_s2, %s228_s2 }
  0x1a   :  { %183 = vmatpush3.bf16.msra.mxu0 %v203_v2  ;;  %p235_p11 = por %p234_p10, %p233_p9 }
  0x1c   :  { %p236_p12 = pnand %p235_p11, %p229_p8 }
  0x1d   :  { %185 = vmatmul.mubr.msk.bf16.vlgmr.msra.gmra.mrb[0].mxu0 %vm61_vm1, %v37_v4 }
  0x96   :  { %v112_v16 = vpop.permute.xlu0 %111 }
  0xf0   :  { %v99_v8 = vpop.f32.mrb[0].mxu0 }
  0xf1   :  { %v100_v9 = vadd.f32 %v171_v7, %v99_v8  ;;  %v186_v10 = vpop.f32.mrb[1].mxu0 }
  0xf2   :  { %v102_v11 = vpop.f32.mrb[2].mxu0 }
  0xf3   :  { %204 = vtanh.f32 %v100_v9  ;;  %v187_v12 = vpop.f32.mrb[3].mxu0 }
  0xfd   :  { %v205_v13 = vpop.eup %204 }
  0xfe   :  { %v107_v14 = vpack.c.bf16 %v205_v13, %v205_v13 }
 0x100   :  { %189 = vmatpush3.bf16.xpose.msra.mxu1 %v107_v14 }
 0x107   :  { %191 = vmatmul.mubr.bf16.vlgmr.msra.gmra.mrb[0].mxu1 %v106_v15 }
 0x1da   :  { %v148_v17 = vpop.f32.mrb[0].mxu1 }
 0x1db   :  { %v149_v18 = vadd.f32 %v148_v17, %v112_v16  ;;  %v192_v19 = vpop.f32.mrb[1].mxu1 }
 0x1dc   :  { %v151_v20 = vpop.f32.mrb[2].mxu1 }
 0x1dd   :  { %v193_v21 = vpop.f32.mrb[3].mxu1  ;;  %155 = vst.msk [vmem:[#allocation5] sm:$0x7] %vm154_vm2, %v149_v18 }
 0x1de   :  { %239 = shalt.err (!%p236_p12)
}
 0x1df   :  { %s240_s15 = scalar_lea.hbm %s332_s5, 64 }
 0x1e0   :  { %p241_p13 = scmp.ne.s32.totalorder %s332_s5, %s240_s15  ;;  %p244_p0 = scmp.lt.u32.totalorder %s240_s15, %s332_s5 }
 0x1e2   :  { %p246_p1 = pnand %p244_p0, %p241_p13 }
 0x1e4   :  { %249 = shalt.err (!%p246_p1)
}
 0x1e5   :  { %165 = dma.vmem_to_hbm [thread:$0]  %s163_s13, 64, %s332_s5, [#allocation4]  }
 0x1e6   :  { %252 = dma.done.wait [#allocation4], 64  }
 0x1e7   :  { %253 = vsyncadd [#allocation4], 4294967232 }
 0x1e8   :  { %169 = vsyncpa [#allocation3], 1 }
 0x1e9   :  { %170 = vsyncpa [#allocation4], 1 }

</bundles_post_ra>
